<compile_context>
chip_gen: v7x
topology: tpu7x:2x2x1
jax: 0.10.0
libtpu: 0.0.40
codegen_flags: <defaults>
</compile_context>

<pallas_src>
import functools
import math

import jax
import jax.numpy as jnp
from jax import lax
from jax.experimental import pallas as pl
from jax.experimental.pallas import tpu as pltpu


def mhsa_kernel(xq_ref, xkv_ref, wq_ref, wk_ref, wv_ref, wo_ref, b_ref,
                o_ref, acc_ref, *, compute_dtype):
    """One grid step = (batch b, q-tile qi, head h).

    xq_ref : (1, TQ, D)  x rows for this q tile            (compute_dtype)
    xkv_ref: (1, L,  D)  full-sequence x for K/V           (compute_dtype)
    wq_ref : (1, D, dk)  per-head Q weight, 1/sqrt(dk) pre-folded
    wk_ref : (1, D, dk)  per-head K weight
    wv_ref : (1, D, dk)  per-head V weight
    wo_ref : (1, dk, D)  per-head slice of output projection
    b_ref  : (1, D)      output-projection bias (f32)
    o_ref  : (1, TQ, D)  output tile
    acc_ref: (TQ, D) f32 scratch accumulating head contributions
    """
    h = pl.program_id(2)
    nh = pl.num_programs(2)

    @pl.when(h == 0)
    def _init():
        acc_ref[...] = jnp.zeros_like(acc_ref)

    xq = xq_ref[0]            # (TQ, D)
    xkv = xkv_ref[0]          # (L, D)

    # Per-head projections: contraction over full D (good MXU utilization).
    q = jnp.dot(xq, wq_ref[0], preferred_element_type=jnp.float32
                ).astype(compute_dtype)                      # (TQ, dk), scaled
    k = jnp.dot(xkv, wk_ref[0], preferred_element_type=jnp.float32
                ).astype(compute_dtype)                      # (L, dk)
    v = jnp.dot(xkv, wv_ref[0], preferred_element_type=jnp.float32
                ).astype(compute_dtype)                      # (L, dk)

    # Scores (scale already folded into wq); softmax math stays f32.
    s = lax.dot_general(q, k, (((1,), (1,)), ((), ())),
                        preferred_element_type=jnp.float32)  # (TQ, L)
    s = s - jnp.max(s, axis=-1, keepdims=True)
    p = jnp.exp(s)
    denom = jnp.sum(p, axis=-1, keepdims=True)               # (TQ, 1)

    o_h = jnp.dot(p.astype(compute_dtype), v,
                  preferred_element_type=jnp.float32)        # (TQ, dk)
    # Normalize AFTER p@v (O(TQ*dk) not O(TQ*L)); approx recip -> EUP slot.
    o_h = o_h * pl.reciprocal(denom, approx=True)

    # Output projection contribution of this head, accumulated in f32.
    acc_ref[...] += jnp.dot(o_h.astype(compute_dtype), wo_ref[0],
                            preferred_element_type=jnp.float32)  # (TQ, D)

    @pl.when(h == nh - 1)
    def _finalize():
        o_ref[0] = (acc_ref[...] + b_ref[...]).astype(o_ref.dtype)


def multi_head_self_attn(x, w_qkv, w_proj, b_proj, *, n_heads,
                         compute_dtype=jnp.bfloat16, tq=None,
                         vmem_limit_bytes=None):
    """x: (B, L, D); w_qkv: (3D, D), w_proj: (D, D), b_proj: (D,) PyTorch layout."""
    B, L, D = x.shape
    assert D % n_heads == 0
    dk = D // n_heads
    scale = 1.0 / math.sqrt(dk)

    if tq is None:
        tq = 128 if L % 128 == 0 else L
    assert L % tq == 0
    qt = L // tq

    # PyTorch nn.Linear computes y = x @ W.T; pre-transpose once in the wrapper.
    w_q_t = jnp.transpose(w_qkv[0 * D:1 * D, :])   # (D, D)
    w_k_t = jnp.transpose(w_qkv[1 * D:2 * D, :])   # (D, D)
    w_v_t = jnp.transpose(w_qkv[2 * D:3 * D, :])   # (D, D)
    w_p_t = jnp.transpose(w_proj)                  # (D, D)

    # Split weights per head OUTSIDE the kernel so the kernel never lane-slices.
    def per_head_in(w):  # (D, D) -> (H, D, dk)
        return jnp.transpose(w.reshape(D, n_heads, dk), (1, 0, 2))

    wq_h = (per_head_in(w_q_t) * scale).astype(compute_dtype)  # fold 1/sqrt(dk)
    wk_h = per_head_in(w_k_t).astype(compute_dtype)
    wv_h = per_head_in(w_v_t).astype(compute_dtype)
    wo_h = w_p_t.reshape(n_heads, dk, D).astype(compute_dtype)  # (H, dk, D)
    b2d = b_proj.reshape(1, D).astype(jnp.float32)

    x_c = x.astype(compute_dtype)

    kernel = functools.partial(mhsa_kernel, compute_dtype=compute_dtype)

    # Advisory cost estimate for XLA's scheduler.
    isz = jnp.dtype(compute_dtype).itemsize
    flops = int(2 * B * L * D * D * (2 + 2 * qt) + 4 * B * L * L * D)
    transcendentals = int(B * n_heads * L * L)
    bytes_accessed = int(
        2 * B * L * D * isz                        # x (q view + kv view)
        + 4 * B * qt * n_heads * D * dk * isz      # weights (refetched per step)
        + B * L * D * jnp.dtype(x.dtype).itemsize  # output
    )

    cparams = dict(dimension_semantics=("parallel", "parallel", "arbitrary"))
    if vmem_limit_bytes is not None:
        # On v7x (64 MiB VMEM) set this explicitly at production shapes.
        cparams["vmem_limit_bytes"] = vmem_limit_bytes

    return pl.pallas_call(
        kernel,
        out_shape=jax.ShapeDtypeStruct((B, L, D), x.dtype),
        grid_spec=pltpu.PrefetchScalarGridSpec(
            num_scalar_prefetch=0,
            grid=(B, qt, n_heads),
            in_specs=[
                pl.BlockSpec((1, tq, D), lambda b, qi, h: (b, qi, 0)),  # x (Q rows)
                pl.BlockSpec((1, L, D), lambda b, qi, h: (b, 0, 0)),    # x (K/V rows)
                pl.BlockSpec((1, D, dk), lambda b, qi, h: (h, 0, 0)),   # wq head h
                pl.BlockSpec((1, D, dk), lambda b, qi, h: (h, 0, 0)),   # wk head h
                pl.BlockSpec((1, D, dk), lambda b, qi, h: (h, 0, 0)),   # wv head h
                pl.BlockSpec((1, dk, D), lambda b, qi, h: (h, 0, 0)),   # wproj head h
                pl.BlockSpec((1, D), lambda b, qi, h: (0, 0)),          # bias
            ],
            out_specs=pl.BlockSpec((1, tq, D), lambda b, qi, h: (b, qi, 0)),
            scratch_shapes=[pltpu.VMEM((tq, D), jnp.float32)],
        ),
        compiler_params=pltpu.CompilerParams(**cparams),
        cost_estimate=pl.CostEstimate(flops=flops,
                                      transcendentals=transcendentals,
                                      bytes_accessed=bytes_accessed),
    )(x_c, x_c, wq_h, wk_h, wv_h, wo_h, b2d)


def reference_mhsa(x, w_qkv, w_proj, b_proj, *, n_heads):
    """Plain-JAX f32 reference mirroring the PyTorch forward."""
    B, L, D = x.shape
    d_k = D // n_heads
    qkv = x @ w_qkv.T                                    # (B, L, 3D)
    q, k, v = jnp.split(qkv, 3, axis=-1)

    def split(t):
        return jnp.transpose(t.reshape(B, L, n_heads, d_k), (0, 2, 1, 3))

    q, k, v = map(split, (q, k, v))                      # (B, nh, L, dk)
    scores = q @ jnp.swapaxes(k, -2, -1) / jnp.sqrt(jnp.float32(d_k))
    attn = jax.nn.softmax(scores, axis=-1)
    out = jnp.transpose(attn @ v, (0, 2, 1, 3)).reshape(B, L, D)
    return out @ w_proj.T + b_proj


if __name__ == "__main__":
    B, L, D, NH = 2, 8, 32, 4

    key = jax.random.PRNGKey(0)
    kx, kq, kp, kb = jax.random.split(key, 4)

    x = jax.random.normal(kx, (B, L, D), dtype=jnp.float32)
    # PyTorch nn.Linear weight layout: (out_features, in_features).
    w_qkv = jax.random.normal(kq, (3 * D, D), dtype=jnp.float32) * 0.1
    w_proj = jax.random.normal(kp, (D, D), dtype=jnp.float32) * 0.1
    b_proj = jax.random.normal(kb, (D,), dtype=jnp.float32) * 0.1

    out = multi_head_self_attn(x, w_qkv, w_proj, b_proj, n_heads=NH)
    out = jax.block_until_ready(out)

    ref = reference_mhsa(x, w_qkv, w_proj, b_proj, n_heads=NH)
    assert out.shape == (B, L, D)
    max_err = jnp.max(jnp.abs(out - ref))
    # bf16 MXU inputs + approx reciprocal -> loosened tolerance vs. pure f32.
    assert jnp.allclose(out, ref, atol=2e-2, rtol=2e-2), f"max abs err {max_err}"

    print("KERNEL_OK")
</pallas_src>

<mosaic_0001>
module attributes {stable_mosaic.version = 11 : i64} {
  func.func @mhsa_kernel(%arg0: i32, %arg1: i32, %arg2: i32, %arg3: memref<1x8x32xbf16, #tpu.memory_space<vmem>>, %arg4: memref<1x8x32xbf16, #tpu.memory_space<vmem>>, %arg5: memref<1x32x8xbf16, #tpu.memory_space<vmem>>, %arg6: memref<1x32x8xbf16, #tpu.memory_space<vmem>>, %arg7: memref<1x32x8xbf16, #tpu.memory_space<vmem>>, %arg8: memref<1x8x32xbf16, #tpu.memory_space<vmem>>, %arg9: memref<1x32xf32, #tpu.memory_space<vmem>>, %arg10: memref<1x8x32xf32, #tpu.memory_space<vmem>>, %arg11: memref<8x32xf32, #tpu.memory_space<vmem>>) attributes {dimension_semantics = [#tpu.dimension_semantics<parallel>, #tpu.dimension_semantics<parallel>, #tpu.dimension_semantics<arbitrary>], iteration_bounds = array<i64: 2, 1, 4>, scalar_prefetch = 0 : i64, scratch_operands = 1 : i64, tpu.core_type = #tpu.core_type<tc>, window_params = [{transform_indices = @transform_0, window_bounds = array<i64: 1, 8, 32>}, {transform_indices = @transform_1, window_bounds = array<i64: 1, 8, 32>}, {transform_indices = @transform_2, window_bounds = array<i64: 1, 32, 8>}, {transform_indices = @transform_3, window_bounds = array<i64: 1, 32, 8>}, {transform_indices = @transform_4, window_bounds = array<i64: 1, 32, 8>}, {transform_indices = @transform_5, window_bounds = array<i64: 1, 8, 32>}, {pipeline_mode = #tpu.pipeline_mode<synchronous>, transform_indices = @transform_6, window_bounds = array<i64: 1, 32>}, {transform_indices = @transform_7, window_bounds = array<i64: 1, 8, 32>}]} {
    %c0_i32 = arith.constant 0 : i32
    %0 = arith.cmpi eq, %arg2, %c0_i32 : i32
    %1 = arith.extui %0 : i1 to i32
    %c0_i32_0 = arith.constant 0 : i32
    %2 = arith.cmpi ne, %1, %c0_i32_0 : i32
    scf.if %2 {
      %cst_30 = arith.constant 0.000000e+00 : f32
      %42 = vector.broadcast %cst_30 : f32 to vector<8x32xf32>
      %c0_31 = arith.constant 0 : index
      %c0_32 = arith.constant 0 : index
      %43 = vector.load %arg11[%c0_31, %c0_32] : memref<8x32xf32, #tpu.memory_space<vmem>>, vector<8x32xf32>
      tpu.vector_store %arg11[%c0_31, %c0_32], %42 {strides = array<i32>} : memref<8x32xf32, #tpu.memory_space<vmem>>, vector<8x32xf32>,
    } else {
    }
    %c0 = arith.constant 0 : index
    %c0_1 = arith.constant 0 : index
    %c0_2 = arith.constant 0 : index
    %3 = vector.load %arg3[%c0, %c0_1, %c0_2] : memref<1x8x32xbf16, #tpu.memory_space<vmem>>, vector<1x8x32xbf16>
    %4 = vector.shape_cast %3 : vector<1x8x32xbf16> to vector<8x32xbf16>
    %c0_3 = arith.constant 0 : index
    %c0_4 = arith.constant 0 : index
    %c0_5 = arith.constant 0 : index
    %5 = vector.load %arg4[%c0_3, %c0_4, %c0_5] : memref<1x8x32xbf16, #tpu.memory_space<vmem>>, vector<1x8x32xbf16>
    %6 = vector.shape_cast %5 : vector<1x8x32xbf16> to vector<8x32xbf16>
    %c0_6 = arith.constant 0 : index
    %c0_7 = arith.constant 0 : index
    %c0_8 = arith.constant 0 : index
    %7 = vector.load %arg5[%c0_6, %c0_7, %c0_8] : memref<1x32x8xbf16, #tpu.memory_space<vmem>>, vector<1x32x8xbf16>
    %8 = vector.shape_cast %7 : vector<1x32x8xbf16> to vector<32x8xbf16>
    %cst = arith.constant dense<0.000000e+00> : vector<8x8xf32>
    %9 = tpu.matmul %4, %8, %cst {dimension_numbers = #tpu.dot_dimension_numbers<[1], [0], [0], [1], [0, 0, 1, 1], [], []>} : vector<8x32xbf16>, vector<32x8xbf16>, vector<8x8xf32> -> vector<8x8xf32>
    %10 = arith.truncf %9 : vector<8x8xf32> to vector<8x8xbf16>
    %c0_9 = arith.constant 0 : index
    %c0_10 = arith.constant 0 : index
    %c0_11 = arith.constant 0 : index
    %11 = vector.load %arg6[%c0_9, %c0_10, %c0_11] : memref<1x32x8xbf16, #tpu.memory_space<vmem>>, vector<1x32x8xbf16>
    %12 = vector.shape_cast %11 : vector<1x32x8xbf16> to vector<32x8xbf16>
    %cst_12 = arith.constant dense<0.000000e+00> : vector<8x8xf32>
    %13 = tpu.matmul %6, %12, %cst_12 {dimension_numbers = #tpu.dot_dimension_numbers<[1], [0], [0], [1], [0, 0, 1, 1], [], []>} : vector<8x32xbf16>, vector<32x8xbf16>, vector<8x8xf32> -> vector<8x8xf32>
    %14 = arith.truncf %13 : vector<8x8xf32> to vector<8x8xbf16>
    %c0_13 = arith.constant 0 : index
    %c0_14 = arith.constant 0 : index
    %c0_15 = arith.constant 0 : index
    %15 = vector.load %arg7[%c0_13, %c0_14, %c0_15] : memref<1x32x8xbf16, #tpu.memory_space<vmem>>, vector<1x32x8xbf16>
    %16 = vector.shape_cast %15 : vector<1x32x8xbf16> to vector<32x8xbf16>
    %cst_16 = arith.constant dense<0.000000e+00> : vector<8x8xf32>
    %17 = tpu.matmul %6, %16, %cst_16 {dimension_numbers = #tpu.dot_dimension_numbers<[1], [0], [0], [1], [0, 0, 1, 1], [], []>} : vector<8x32xbf16>, vector<32x8xbf16>, vector<8x8xf32> -> vector<8x8xf32>
    %18 = arith.truncf %17 : vector<8x8xf32> to vector<8x8xbf16>
    %cst_17 = arith.constant dense<0.000000e+00> : vector<8x8xf32>
    %19 = tpu.matmul %10, %14, %cst_17 {dimension_numbers = #tpu.dot_dimension_numbers<[1], [1], [0], [0], [0, 0, 1, 0], [], []>} : vector<8x8xbf16>, vector<8x8xbf16>, vector<8x8xf32> -> vector<8x8xf32>
    %cst_18 = arith.constant dense<0xFF800000> : vector<8xf32>
    %20 = vector.multi_reduction <maximumf>, %19, %cst_18 [1] : vector<8x8xf32> to vector<8xf32>
    %21 = vector.shape_cast %20 : vector<8xf32> to vector<8x1xf32>
    %22 = vector.broadcast %21 : vector<8x1xf32> to vector<8x8xf32>
    %23 = arith.subf %19, %22 : vector<8x8xf32>
    %24 = math.exp %23 : vector<8x8xf32>
    %cst_19 = arith.constant dense<0.000000e+00> : vector<8xf32>
    %25 = vector.multi_reduction <add>, %24, %cst_19 [1] : vector<8x8xf32> to vector<8xf32>
    %26 = vector.shape_cast %25 : vector<8xf32> to vector<8x1xf32>
    %27 = arith.truncf %24 : vector<8x8xf32> to vector<8x8xbf16>
    %cst_20 = arith.constant dense<0.000000e+00> : vector<8x8xf32>
    %28 = tpu.matmul %27, %18, %cst_20 {dimension_numbers = #tpu.dot_dimension_numbers<[1], [0], [0], [1], [0, 0, 1, 1], [], []>} : vector<8x8xbf16>, vector<8x8xbf16>, vector<8x8xf32> -> vector<8x8xf32>
    %29 = tpu.reciprocal %26 {approx = true} : vector<8x1xf32> -> vector<8x1xf32>
    %30 = vector.broadcast %29 : vector<8x1xf32> to vector<8x8xf32>
    %31 = arith.mulf %28, %30 : vector<8x8xf32>
    %c0_21 = arith.constant 0 : index
    %c0_22 = arith.constant 0 : index
    %32 = vector.load %arg11[%c0_21, %c0_22] : memref<8x32xf32, #tpu.memory_space<vmem>>, vector<8x32xf32>
    %33 = arith.truncf %31 : vector<8x8xf32> to vector<8x8xbf16>
    %c0_23 = arith.constant 0 : index
    %c0_24 = arith.constant 0 : index
    %c0_25 = arith.constant 0 : index
    %34 = vector.load %arg8[%c0_23, %c0_24, %c0_25] : memref<1x8x32xbf16, #tpu.memory_space<vmem>>, vector<1x8x32xbf16>
    %35 = vector.shape_cast %34 : vector<1x8x32xbf16> to vector<8x32xbf16>
    %cst_26 = arith.constant dense<0.000000e+00> : vector<8x32xf32>
    %36 = tpu.matmul %33, %35, %cst_26 {dimension_numbers = #tpu.dot_dimension_numbers<[1], [0], [0], [1], [0, 0, 1, 1], [], []>} : vector<8x8xbf16>, vector<8x32xbf16>, vector<8x32xf32> -> vector<8x32xf32>
    %37 = arith.addf %32, %36 : vector<8x32xf32>
    %c0_27 = arith.constant 0 : index
    %c0_28 = arith.constant 0 : index
    %38 = vector.load %arg11[%c0_27, %c0_28] : memref<8x32xf32, #tpu.memory_space<vmem>>, vector<8x32xf32>
    tpu.vector_store %arg11[%c0_27, %c0_28], %37 {strides = array<i32>} : memref<8x32xf32, #tpu.memory_space<vmem>>, vector<8x32xf32>,
    %c3_i32 = arith.constant 3 : i32
    %39 = arith.cmpi eq, %arg2, %c3_i32 : i32
    %40 = arith.extui %39 : i1 to i32
    %c0_i32_29 = arith.constant 0 : i32
    %41 = arith.cmpi ne, %40, %c0_i32_29 : i32
    scf.if %41 {
      %c0_30 = arith.constant 0 : index
      %c0_31 = arith.constant 0 : index
      %42 = vector.load %arg11[%c0_30, %c0_31] : memref<8x32xf32, #tpu.memory_space<vmem>>, vector<8x32xf32>
      %c0_32 = arith.constant 0 : index
      %c0_33 = arith.constant 0 : index
      %43 = vector.load %arg9[%c0_32, %c0_33] : memref<1x32xf32, #tpu.memory_space<vmem>>, vector<1x32xf32>
      %44 = vector.broadcast %43 : vector<1x32xf32> to vector<8x32xf32>
      %45 = arith.addf %42, %44 : vector<8x32xf32>
      %c0_34 = arith.constant 0 : index
      %c0_35 = arith.constant 0 : index
      %c0_36 = arith.constant 0 : index
      %46 = vector.load %arg10[%c0_34, %c0_35, %c0_36] : memref<1x8x32xf32, #tpu.memory_space<vmem>>, vector<1x8x32xf32>
      %47 = vector.shape_cast %46 : vector<1x8x32xf32> to vector<8x32xf32>
      %48 = vector.shape_cast %45 : vector<8x32xf32> to vector<1x8x32xf32>
      tpu.vector_store %arg10[%c0_34, %c0_35, %c0_36], %48 {strides = array<i32>} : memref<1x8x32xf32, #tpu.memory_space<vmem>>, vector<1x8x32xf32>,
    } else {
    }
    return
  }
  func.func @transform_0(%arg0: i32, %arg1: i32, %arg2: i32) -> (i32, i32, i32) {
    %c0_i32 = arith.constant 0 : i32
    %c0_i32_0 = arith.constant 0 : i32
    return %arg0, %arg1, %c0_i32 : i32, i32, i32
  }
  func.func @transform_1(%arg0: i32, %arg1: i32, %arg2: i32) -> (i32, i32, i32) {
    %c0_i32 = arith.constant 0 : i32
    %c0_i32_0 = arith.constant 0 : i32
    %c0_i32_1 = arith.constant 0 : i32
    return %arg0, %c0_i32, %c0_i32_0 : i32, i32, i32
  }
  func.func @transform_2(%arg0: i32, %arg1: i32, %arg2: i32) -> (i32, i32, i32) {
    %c0_i32 = arith.constant 0 : i32
    %c0_i32_0 = arith.constant 0 : i32
    %c0_i32_1 = arith.constant 0 : i32
    return %arg2, %c0_i32, %c0_i32_0 : i32, i32, i32
  }
  func.func @transform_3(%arg0: i32, %arg1: i32, %arg2: i32) -> (i32, i32, i32) {
    %c0_i32 = arith.constant 0 : i32
    %c0_i32_0 = arith.constant 0 : i32
    %c0_i32_1 = arith.constant 0 : i32
    return %arg2, %c0_i32, %c0_i32_0 : i32, i32, i32
  }
  func.func @transform_4(%arg0: i32, %arg1: i32, %arg2: i32) -> (i32, i32, i32) {
    %c0_i32 = arith.constant 0 : i32
    %c0_i32_0 = arith.constant 0 : i32
    %c0_i32_1 = arith.constant 0 : i32
    return %arg2, %c0_i32, %c0_i32_0 : i32, i32, i32
  }
  func.func @transform_5(%arg0: i32, %arg1: i32, %arg2: i32) -> (i32, i32, i32) {
    %c0_i32 = arith.constant 0 : i32
    %c0_i32_0 = arith.constant 0 : i32
    %c0_i32_1 = arith.constant 0 : i32
    return %arg2, %c0_i32, %c0_i32_0 : i32, i32, i32
  }
  func.func @transform_6(%arg0: i32, %arg1: i32, %arg2: i32) -> (i32, i32) {
    %c0_i32 = arith.constant 0 : i32
    %c0_i32_0 = arith.constant 0 : i32
    %c0_i32_1 = arith.constant 0 : i32
    return %c0_i32, %c0_i32_0 : i32, i32
  }
  func.func @transform_7(%arg0: i32, %arg1: i32, %arg2: i32) -> (i32, i32, i32) {
    %c0_i32 = arith.constant 0 : i32
    %c0_i32_0 = arith.constant 0 : i32
    return %arg0, %arg1, %c0_i32 : i32, i32, i32
  }
}

</mosaic_0001>

<bundles_post_ra>
// kernel: tpu_custom_call.1
= control target key start
LH: loop header
LB: loop body
LE: loop exit
PB: predicated region body
PF: predicated region fallthrough
CT: control target
= control target key end

     0   :  { %s1416_s0 = inlined_call_operand.vmem [shape: bf16[2,8,32], index: 0, kind: input, shape index: {}]   ;;  %s1417_s1 = inlined_call_operand.vmem [shape: bf16[2,8,32], index: 1, kind: input, shape index: {}]   ;;  %s1418_s2 = inlined_call_operand.vmem [shape: bf16[4,32,8], index: 2, kind: input, shape index: {}]   ;;  %s1419_s3 = inlined_call_operand.vmem [shape: bf16[4,32,8], index: 3, kind: input, shape index: {}]   ;;  %s1420_s4 = inlined_call_operand.vmem [shape: bf16[4,32,8], index: 4, kind: input, shape index: {}]   ;;  %s1421_s5 = inlined_call_operand.vmem [shape: bf16[4,8,32], index: 5, kind: input, shape index: {}]   ;;  %s1422_s6 = inlined_call_operand.vmem [shape: f32[1,32], index: 6, kind: input, shape index: {}]   ;;  %s1423_s7 = inlined_call_operand.hbm [shape: f32[2,8,32], index: 7, kind: output, shape index: {}]  }
   0x1   :  { %1433 = sst [smem:[#allocation15_spill]] %s1416_s0 }
   0x2   :  { %12 = vsyncpa [#allocation4], 0 }
   0x3   :  { %14 = vsyncpa [#allocation4 + $0x1], 0  ;;  %s1228_s24 = smov 0   ;;  %s1230_s25 = smov 0  }
   0x4   :  { %s1232_s26 = smov 0   ;;  %s1234_s27 = smov 0  }
   0x5   :  { %s1236_s28 = smov 0   ;;  %s1238_s29 = smov 0  }
   0x6   :  { %s1240_s30 = smov 0   ;;  %s1242_s8 = smov 0  }
   0x7 LB: > { %1434 = sst [smem:[#allocation6_spill]] %s1154_s24  ;;  %s910_s9 = sadd.s32 4294967295, %s1182_s8   ;;  %s1182_s8 = sphi %s1242_s8, %s20_s8   ;;  %s1178_s30 = sphi %s1240_s30, %s1455_s30   ;;  %s1174_s29 = sphi %s1238_s29, %s1459_s29   ;;  %s1170_s28 = sphi %s1236_s28, %s1453_s28   ;;  %s1166_s27 = sphi %s1234_s27, %s1452_s27   ;;  %s1162_s26 = sphi %s1232_s26, %s1458_s26   ;;  %s1158_s25 = sphi %s1230_s25, %s1457_s25   ;;  %s1154_s24 = sphi %s1228_s24, %s1456_s24  }
   0x8   : > { %1435 = sst [smem:[#allocation7_spill]] %s1162_s26  ;;  %s911_s10 = sadd.s32 4294967294, %s1182_s8  }
   0x9   : > { %1436 = sst [smem:[#allocation8_spill]] %s1174_s29  ;;  %s32_s11 = sadd.s32 1, %s1174_s29 }
   0xa   : > { %1437 = sst [smem:[#allocation9_spill]] %s1178_s30  ;;  %p33_p0 = scmp.ge.s32.totalorder %s32_s11, 4 }
   0xb   : > { %1438 = sst [smem:[#allocation10_spill]] %s1182_s8  ;;  %s39_s12 = sadd.s32 1, %s1178_s30 }
   0xc   : > { %p237_p1 = scmp.ne.s32.totalorder %s1162_s26, %s1158_s25  ;;  %p238_p2 = scmp.eq.s32.totalorder %s910_s9, 7 }
   0xd   : > { %s1461_s11 = smov (%p33_p0, %s32_s11), 0  ;;  %s1463_s12 = smov (!%p33_p0, %s39_s12), %s1178_s30 }
   0xe   : > { %1439 = sst [smem:[#allocation11_spill]] %s1461_s11  ;;  %p1277_p3 = por %p238_p2, %p237_p1 }
   0xf   : > { %p243_p4 = scmp.ne.s32.totalorder %s1158_s25, %s1154_s24  ;;  %p41_p5 = scmp.ge.s32.totalorder %s1463_s12, 2 }
  0x10   : > { %p244_p6 = scmp.eq.s32.totalorder %s911_s10, 7  ;;  %p914_p7 = scmp.ge.s32.totalorder %s1182_s8, 1 }
  0x11   : > { %p313_p8 = scmp.lt.s32.totalorder %s1182_s8, 9  ;;  %s1465_s12 = smov (%p41_p5, %s1463_s12), 0 }
  0x12   : > { %1441 = sst [smem:[#allocation12_spill]] %s1465_s12  ;;  %p1287_p9 = por %p244_p6, %p243_p4 }
  0x13   : > { %p314_p10 = pnand %p914_p7, %p313_p8  ;;  %s222_s15 = ssub.s32 %s1178_s30, %s1465_s12 }
  0x14   : > { %s1442_s14 = scalar_select %p1287_p9, 1, 0 }
  0x15   : > { %s227_s16 = sadd.s32 1, %s1162_s26  ;;  %p225_p11 = scmp.eq.s32.totalorder %s222_s15, 0 }
  0x16   : > { %1443 = sst [smem:[#allocation13_spill]] %s1442_s14  ;;  %317 = sbr.rel (%p314_p10) target bundleno = 1107 (0x453), region = 48 }
  0x17   : > { %s1295_s17 = scalar_select %p225_p11, %s1162_s26, %s227_s16  }
  0x18   : > { %s1427_s18 = sand.u32 (!%p314_p10), 1, %s1158_s25   ;;  %p370_p12 = scmp.lt.s32.totalorder (!%p314_p10), %s1170_s28, 1 }
  0x19   : > { %1444 = sst [smem:[#allocation14_spill]] %s1295_s17  ;;  %s1301_s19 = sshll.u32 (!%p314_p10), %s1427_s18, 3 }
  0x1a   : > { %p381_p13 = scmp.lt.s32.totalorder (!%p314_p10), %s1166_s27, 3  ;;  %s1445_s0 = sld [smem:[#allocation15_spill]] (!%p314_p10) }
  0x1b   : > { %p925_p0 = scmp.ne.s32.totalorder (!%p314_p10), %s1166_s27, 0 }
  0x1d   : > { %s371_s20 = scalar_select %p370_p12, %s1170_s28, 1 }
  0x1e   : > { %s382_s21 = scalar_select %p381_p13, %s1166_s27, 3 }
  0x1f   : > { %s916_s22 = sshll.u32 %s371_s20, 2  ;;  %404 = sbr.rel (%p925_p0) target bundleno = 38 (0x26), region = 52  ;;  %vm405_vm0 = vcmask (!%p925_p0), 261120   ;;  %v1184_v0 = vmov (!%p925_p0), 0.0  }
  0x20   : > { %s1309_s10 = scalar_lea.vmem %s1445_s0, %s916_s22  ;;  %s380_s12 = scalar_lea.vmem %s1417_s1, %s916_s22  ;;  %406 = vst.msk [vmem:[#allocation2] sm:$0xff] (!%p925_p0), %vm405_vm0, %v1184_v0 }
  0x21   : > { %s944_s11 = sshll.u32 %s382_s21, 4  ;;  %s924_s30 = sshll.u32 %s382_s21, 2 }
  0x22   : > { %s385_s18 = scalar_lea.vmem %s1418_s2, %s944_s11  ;;  %s390_s24 = scalar_lea.vmem %s1419_s3, %s944_s11 }
  0x23   : > { %s1323_s23 = scalar_lea.vmem %s1420_s4, %s944_s11  ;;  %s1328_s15 = scalar_lea.vmem %s1421_s5, %s924_s30 }
  0x24   : > { %s369_s22 = scalar_lea.vmem [#allocation3], %s1301_s19 }
  0x26 PF: > { %v1078_v1 = vld [vmem:[%s390_s24] sm:$0xff]   ;;  %v1185_v2 = vmov 0.0   ;;  %v1079_v3 = vld [vmem:[%s390_s24 + $0x8] sm:$0xff]   ;;  %vm1186_vm1 = vmmov 0   ;;  %vm425_vm2 = vcmask 261120   ;;  %vm587_vm3 = vcmask 64512  }
  0x27   : > { %970 = vmatprep.subr.bf16.mxu1 %v1185_v2  ;;  %962 = vmatprep.subr.bf16.mxu0 %v1185_v2  ;;  %v1080_v4 = vld [vmem:[%s385_s18] sm:$0xff]   ;;  %v1081_v5 = vld [vmem:[%s385_s18 + $0x8] sm:$0xff]   ;;  %vm647_vm4 = vcmask 1043456   ;;  %p938_p1 = scmp.ne.s32.totalorder %s1166_s27, 3 }
  0x28   : > { %971 = vmatpush3.bf16.msra.mxu1 %v1078_v1  ;;  %974 = vmatprep.mubr.msk.bf16.mxu1 %vm1186_vm1, %v1185_v2  ;;  %v408_v6 = vld [vmem:[%s380_s12] sm:$0xf]  ;;  %v1083_v9 = vld [vmem:[%s1323_s23 + $0x8] sm:$0xff]  }
  0x29   : > { %972 = vmatprep.subr.bf16.mxu1 %v1185_v2  ;;  %966 = vmatprep.mubr.msk.bf16.mxu0 %vm1186_vm1, %v1185_v2  ;;  %v407_v7 = vld [vmem:[%s1309_s10] sm:$0xf] }
  0x2a   : > { %963 = vmatpush3.bf16.msra.mxu0 %v1080_v4  ;;  %v1082_v8 = vld [vmem:[%s1323_s23] sm:$0xff]  }
  0x2b   : > { %964 = vmatprep.subr.bf16.mxu0 %v1185_v2  ;;  %v695_v38 = vld [vmem:[%s1328_s15] sm:$0xf] }
  0x2c   : > { %973 = vmatpush3.bf16.msra.mxu1 %v1079_v3  ;;  %v700_v39 = vsel %vm647_vm4, %v695_v38, 0  ;;  %v693_v48 = vld [vmem:[#allocation2] sm:$0xff] }
  0x2d   : > { %986 = vmatprep.subr.bf16.mxu1 %v1185_v2  ;;  %v939_v55 = vld [vmem:[%s1422_s6] ss:$0 sm:$0xff] (!%p938_p1) }
  0x2e   : > { %965 = vmatpush3.bf16.msra.mxu0 %v1081_v5 }
  0x2f   : > { %975 = vmatmul.mubr.msk.bf16.vlgmr.msra.gmra.mrb[0].mxu1 %vm425_vm2, %v408_v6  ;;  %978 = vmatprep.subr.bf16.mxu0 %v1185_v2 }
  0x30   : > { %988 = vmatprep.mubr.msk.bf16.mxu1 %vm1186_vm1, %v1185_v2 }
  0x31   : > { %967 = vmatmul.mubr.msk.bf16.vlgmr.msra.gmra.mrb[0].mxu0 %vm425_vm2, %v407_v7 }
  0x32   : > { %982 = vmatprep.mubr.msk.bf16.mxu0 %vm1186_vm1, %v1185_v2  ;;  %979 = vmatpush3.bf16.msra.mxu0 %v1082_v8 }
  0x33   : > { %980 = vmatprep.subr.bf16.mxu0 %v1185_v2 }
  0x36   : > { %981 = vmatpush3.bf16.msra.mxu0 %v1083_v9 }
  0x37   : > { %992 = vmatprep.subr.bf16.mxu0 %v1185_v2 }
  0x39   : > { %983 = vmatmul.mubr.msk.bf16.vlgmr.msra.gmra.mrb[4].mxu0 %vm425_vm2, %v408_v6 }
  0x3a   : > { %994 = vmatprep.mubr.msk.bf16.mxu0 %vm1186_vm1, %v1185_v2 }
 0x102   : > { %v523_v10 = vpop.f32.mrb[0].mxu1 }
 0x103   : > { %v529_v11 = vpack.c.bf16 %v523_v10, %v523_v10  ;;  %v976_v12 = vpop.f32.mrb[1].mxu1 }
 0x104   : > { %v526_v13 = vpop.f32.mrb[2].mxu1  ;;  %v463_v14 = vpop.f32.mrb[0].mxu0 }
 0x105   : > { %v592_v15 = vsel %vm587_vm3, %v529_v11, 0  ;;  %v977_v16 = vpop.f32.mrb[3].mxu1  ;;  %v968_v17 = vpop.f32.mrb[1].mxu0  ;;  %v469_v20 = vpack.c.bf16 %v463_v14, %v463_v14 }
 0x106   : > { %987 = vmatpush3.bf16.xpose.msra.mxu1 %v592_v15  ;;  %v466_v18 = vpop.f32.mrb[2].mxu0 }
 0x107   : > { %v969_v19 = vpop.f32.mrb[3].mxu0  ;;  %998 = vmatprep.subr.bf16.mxu1 %v1185_v2 }
 0x10c   : > { %v580_v26 = vpop.f32.mrb[4].mxu0 }
 0x10d   : > { %989 = vmatmul.mubr.msk.bf16.vlgmr.msra.gmra.mrb[4].mxu1 %vm587_vm3, %v469_v20  ;;  %v586_v27 = vpack.c.bf16 %v580_v26, %v580_v26  ;;  %v984_v28 = vpop.f32.mrb[5].mxu0 }
 0x10e   : > { %1000 = vmatprep.mubr.msk.bf16.mxu1 %vm1186_vm1, %v1185_v2  ;;  %v583_v29 = vpop.f32.mrb[6].mxu0  ;;  %999 = vmatpush3.bf16.msra.mxu1 %v700_v39 }
 0x10f   : > { %v649_v30 = vsel %vm647_vm4, %v586_v27, 0  ;;  %v985_v31 = vpop.f32.mrb[7].mxu0 }
 0x110   : > { %993 = vmatpush3.bf16.msra.mxu0 %v649_v30 }
 0x1e0   : > { %v628_v21 = vpop.f32.mrb[4].mxu1 }
 0x1e1   : > { %v990_v22 = vpop.f32.mrb[5].mxu1  ;;  %v634_v23 = vsel %vm587_vm3, %v628_v21, -inf }
 0x1e2   : > { %635 = vmax.xlane.f32.xlu0 %v634_v23  ;;  %v631_v24 = vpop.f32.mrb[6].mxu1 }
 0x1e3   : > { %v991_v25 = vpop.f32.mrb[7].mxu1 }
 0x26f   : > { %v636_v32 = vpop.xlane.xlu0 %635 }
 0x270   : > { %v637_v33 = vsub.f32 %v628_v21, %v636_v32 }
 0x272   : > { %v638_v34 = vmul.f32 1.442695, %v637_v33 }
 0x274   : > { %1084 = vpow2.f32 %v638_v34 }
 0x27e   : > { %v1085_v35 = vpop.eup %1084 }
 0x27f   : > { %v640_v36 = vsel %vm587_vm3, %v1085_v35, 0.0  ;;  %v643_v37 = vpack.c.bf16 %v1085_v35, %v1085_v35 }
 0x280   : > { %641 = vadd.xlane.f32.xlu0 %v640_v36 }
 0x281   : > { %995 = vmatmul.mubr.msk.bf16.vlgmr.msra.gmra.mrb[8].mxu0 %vm587_vm3, %v643_v37 }
 0x30d   : > { %v642_v40 = vpop.xlane.xlu0 %641 }
 0x30e   : > { %1086 = vrcp.f32 %v642_v40 }
 0x318   : > { %v1087_v41 = vpop.eup %1086 }
 0x354   : > { %v685_v42 = vpop.f32.mrb[8].mxu0 }
 0x355   : > { %v692_v43 = vmul.f32 %v1087_v41, %v685_v42  ;;  %v996_v44 = vpop.f32.mrb[9].mxu0 }
 0x356   : > { %v688_v45 = vpop.f32.mrb[10].mxu0 }
 0x357   : > { %v694_v46 = vpack.c.bf16 %v692_v43, %v692_v43  ;;  %v997_v47 = vpop.f32.mrb[11].mxu0 }
 0x359   : > { %1001 = vmatmul.mubr.msk.bf16.vlgmr.msra.gmra.mrb[8].mxu1 %vm587_vm3, %v694_v46 }
 0x429   : > { %747 = sbr.rel (%p938_p1) target bundleno = 1082 (0x43a), region = 56 }
 0x42c   : > { %v736_v49 = vpop.f32.mrb[8].mxu1 }
 0x42d   : > { %v742_v50 = vadd.f32 %v736_v49, %v693_v48  ;;  %v1002_v51 = vpop.f32.mrb[9].mxu1 }
 0x42e   : > { %v739_v52 = vpop.f32.mrb[10].mxu1 }
 0x42f   : > { %743 = vst.msk [vmem:[#allocation2] sm:$0xff] %vm425_vm2, %v742_v50  ;;  %v1003_v53 = vpop.f32.mrb[11].mxu1 }
 0x436   : > { %v748_v54 = vld [vmem:[#allocation2] sm:$0xff] }
 0x437   : > { %v756_v56 = vadd.f32 %v939_v55, %v748_v54 }
 0x439   : > { %757 = vst.msk [vmem:[%s369_s22] sm:$0xff] %vm425_vm2, %v756_v56 }
 0x43a PF: > { %s941_s26 = sshll.u32 %s1170_s28, 7  ;;  %s773_s8 = sshll.u32 %s369_s22, 4  ;;  %s774_s8 = int_to_ptr.vmem [resolvable:$true] %s773_s8 }
 0x43b   : > { %s1365_s27 = scalar_lea.hbm %s1423_s7, %s941_s26  ;;  %s1446_s11 = sand.u32 1, %s1158_s25  }
 0x43c   : > { %s759_s12 = scalar_lea.sflag [#allocation4], %s1446_s11  ;;  %s1088_s14 = scalar_lea.vmem %s774_s8, 128 }
 0x43d   : > { %p1089_p2 = scmp.ne.s32.totalorder %s774_s8, %s1088_s14  ;;  %s1187_s17 = smov [#allocation3]  }
 0x43e   : > { %s1092_s18 = sshll.u32 %s1187_s17, 4  ;;  %s1093_s18 = int_to_ptr.vmem [resolvable:$false] %s1092_s18 }
 0x43f   : > { %p1090_p4 = pnand %p1089_p2, %p1277_p3  ;;  %s1094_s21 = scalar_lea.vmem %s1093_s18, 256 }
 0x440   : > { %p1095_p6 = scmp.lt.s32.totalorder %s774_s8, %s1093_s18  ;;  %p1096_p7 = scmp.lt.s32.totalorder %s1094_s21, %s1088_s14 }
 0x441   : > { %p1091_p5 = pneg %p1090_p4 }
 0x442   : > { %p1097_p8 = por %p1096_p7, %p1095_p6 }
 0x444   : > { %p1098_p10 = pnand %p1097_p8, %p1091_p5 }
 0x446   : > { %1101 = shalt.err (!%p1098_p10)
}
 0x447   : > { %s1102_s28 = scalar_lea.hbm %s1365_s27, 128  ;;  %s1106_s16 = scalar_lea.hbm %s1423_s7, 256 }
 0x448   : > { %p1103_p11 = scmp.ne.s32.totalorder %s1365_s27, %s1102_s28  ;;  %p1107_p0 = scmp.lt.u32.totalorder %s1365_s27, %s1423_s7 }
 0x449   : > { %p1108_p1 = scmp.lt.u32.totalorder %s1106_s16, %s1102_s28  ;;  %p1110_p4 = scmp.lt.u32.totalorder %s1102_s28, %s1365_s27 }
 0x44a   : > { %p1104_p12 = pnand %p1103_p11, %p1277_p3 }
 0x44b   : > { %p1109_p2 = por %p1108_p1, %p1107_p0 }
 0x44c   : > { %p1105_p13 = pneg %p1104_p12 }
 0x44d   : > { %p1111_p5 = por %p1110_p4, %p1109_p2 }
 0x44f   : > { %p1112_p6 = pnand %p1111_p5, %p1105_p13 }
 0x451   : > { %1115 = shalt.err (!%p1112_p6)
}
 0x452   : > { %1004 = dma.vmem_to_hbm [thread:$0]  (%p1277_p3), %s774_s8, 128, %s1365_s27, %s759_s12  }
 0x453 PF: > { %s1447_s9 = sld [smem:[#allocation10_spill]]  ;;  %s1448_s15 = sld [smem:[#allocation6_spill]] }
 0x459   : > { %p1010_p7 = scmp.ge.s32.totalorder %s1447_s9, 2  ;;  %s785_s0 = sand.u32 1, %s1448_s15  }
 0x45a   : > { %s786_s24 = scalar_lea.sflag [#allocation4], %s785_s0 }
 0x45b   : > { %p1007_p8 = pnand %p1010_p7, %p1287_p9 }
 0x45d   : > { %1149 = dma.done.wait (!%p1007_p8), %s786_s24, 128  }
 0x45e   : > { %1151 = vsyncadd (!%p1007_p8), %s786_s24, 4294967168  ;;  %s20_s8 = sadd.s32 1, %s1447_s9   ;;  %s1450_s26 = sld [smem:[#allocation7_spill]] }
 0x45f   : > { %p17_p10 = scmp.ge.s32.totalorder %s20_s8, 10   ;;  %s1451_s29 = sld [smem:[#allocation14_spill]] }
 0x460   : > { %s1452_s27 = sld [smem:[#allocation8_spill]]  ;;  %s1453_s28 = sld [smem:[#allocation9_spill]] }
 0x461   : > { %s1454_s13 = sld [smem:[#allocation11_spill]]  ;;  %s1455_s30 = sld [smem:[#allocation12_spill]] }
 0x462   : > { %s1456_s24 = smov %s1158_s25  ;;  %19 = sbr.rel (!%p17_p10) target bundleno = 7 (0x7), region = 106 }
 0x464   : > { %s1457_s25 = smov %s1450_s26 }
 0x465   : > { %s1458_s26 = smov %s1451_s29 }
 0x467   : > { %s1459_s29 = smov %s1454_s13 }
 0x469   :  { %791 = vsyncpa [#allocation4], 1 }
 0x46a   :  { %793 = vsyncpa [#allocation4 + $0x1], 1 }

</bundles_post_ra>
